<compile_context>
chip_gen: v5e
topology: v5e:2x2
jax: 0.10.0
libtpu: 0.0.40
codegen_flags: <defaults>
</compile_context>

<pallas_src>
import jax
import jax.numpy as jnp
from jax import lax
from jax.experimental import pallas as pl
from jax.experimental.pallas import tpu as pltpu

EPS = 1e-5  # nn.BatchNorm2d default eps


# ----------------------------- Pallas kernel ------------------------------- #

def _make_dense_layer_kernel(H, W, g2):
    HW = H * W

    def kernel(x_ref, m_ref, wa_ref, ba_ref, wb_ref, bb_ref, wc_ref, bc_ref,
               o_ref):
        x = x_ref[...]                                  # (Cin, HW)  lane-dense
        masks = m_ref[...]                              # (9, HW)    tap validity

        def shifted_slab(a):
            """(C, HW) -> (9*C, HW): rolled + masked copy per 3x3 tap.

            Tap t = (dy+1)*3 + (dx+1) holds a[:, (i+dy)*W + (j+dx)] for valid
            (i+dy, j+dx) and 0 elsewhere (implicit zero padding); wrap-around
            columns of the roll are exactly the masked-out ones.
            """
            taps = []
            t = 0
            for dy in (-1, 0, 1):
                for dx in (-1, 0, 1):
                    shift = dy * W + dx
                    sh = a if shift == 0 else pltpu.roll(a, (-shift) % HW, axis=1)
                    taps.append(sh * masks[t:t + 1, :])
                    t += 1
            return jnp.concatenate(taps, axis=0)        # (9*C, HW)

        # ---- fused 1x1 branches (rows = [cb1_a ; cb2_a]), BN scale folded ----
        y = jnp.dot(wa_ref[...], x, preferred_element_type=jnp.float32)
        y = jnp.maximum(y + ba_ref[...], 0.0)           # (2*inter, HW)

        # ---- fused cb1_b / cb2_b 3x3 conv (block-diagonal weight) ------------
        z = jnp.dot(wb_ref[...], shifted_slab(y),
                    preferred_element_type=jnp.float32)
        z = jnp.maximum(z + bb_ref[...], 0.0)           # (2*g2, HW) = [cb1_b; cb2_b]

        # ---- cb2_c 3x3 conv on cb2_b ------------------------------------------
        c = jnp.dot(wc_ref[...], shifted_slab(z[g2:2 * g2, :]),
                    preferred_element_type=jnp.float32)
        c = jnp.maximum(c + bc_ref[...], 0.0)           # (g2, HW)

        # ---- torch.cat((x, cb1_b, cb2_c), dim=1): one full-block store --------
        o_ref[...] = jnp.concatenate([x, z[:g2, :], c], axis=0).astype(o_ref.dtype)

    return kernel


# -------------------------------- Wrapper ----------------------------------- #

def _bn_fold(bn):
    gamma, beta, mean, var = bn
    scale = gamma / jnp.sqrt(var + EPS)
    bias = beta - mean * scale
    return scale, bias


def dense_layer_forward(x_nchw, params):
    """Pallas implementation of DenseLayer.forward (eval-mode BatchNorm)."""
    N, Cin, H, W = x_nchw.shape
    HW = H * W
    x = x_nchw.reshape(N, Cin, HW)                      # NCHW: free reshape only

    # ---- fused 1x1 weight (BN scale folded), rows = [cb1_a ; cb2_a] ----------
    w1a, bn1a = params["cb1_a"]
    w2a, bn2a = params["cb2_a"]
    s1a, o1a = _bn_fold(bn1a)
    s2a, o2a = _bn_fold(bn2a)
    inter = w1a.shape[2]
    wa = jnp.concatenate([(w1a[0] * s1a[None, :]).T,
                          (w2a[0] * s2a[None, :]).T], axis=0)    # (2*inter, Cin)
    ba = jnp.concatenate([o1a, o2a])[:, None]                    # (2*inter, 1)

    # ---- fused cb1_b / cb2_b 3x3 block-diagonal weight ------------------------
    w1b, bn1b = params["cb1_b"]
    w2b, bn2b = params["cb2_b"]
    s1b, o1b = _bn_fold(bn1b)
    s2b, o2b = _bn_fold(bn2b)
    g2 = w1b.shape[2]
    w1b_f = w1b * s1b[None, None, :]                             # (9, inter, g2)
    w2b_f = w2b * s2b[None, None, :]
    zeros = jnp.zeros_like(w1b_f)
    wb3 = jnp.concatenate([jnp.concatenate([w1b_f, zeros], axis=1),
                           jnp.concatenate([zeros, w2b_f], axis=1)], axis=2)
    wb = wb3.reshape(9 * 2 * inter, 2 * g2).T                    # (2*g2, 9*2*inter)
    bb = jnp.concatenate([o1b, o2b])[:, None]                    # (2*g2, 1)

    w2c, bn2c = params["cb2_c"]
    s2c, o2c = _bn_fold(bn2c)
    wc = (w2c * s2c[None, None, :]).reshape(9 * g2, g2).T        # (g2, 9*g2)
    bc = o2c[:, None]                                            # (g2, 1)

    # ---- per-tap boundary masks (implicit zero padding), built once ----------
    ii, jj = jnp.meshgrid(jnp.arange(H), jnp.arange(W), indexing="ij")
    mask_rows = []
    for dy in (-1, 0, 1):
        for dx in (-1, 0, 1):
            valid = ((ii + dy >= 0) & (ii + dy < H) &
                     (jj + dx >= 0) & (jj + dx < W))
            mask_rows.append(valid.reshape(HW))
    masks = jnp.stack(mask_rows, axis=0).astype(jnp.float32)     # (9, HW)

    ctot = Cin + 2 * g2

    def full(a):  # whole small array resident in VMEM, same block every step
        return pl.BlockSpec(a.shape, lambda b: (0,) * a.ndim)

    grid_spec = pltpu.PrefetchScalarGridSpec(
        num_scalar_prefetch=0,
        grid=(N,),
        in_specs=[
            pl.BlockSpec((None, Cin, HW), lambda b: (b, 0, 0)),
            full(masks),
            full(wa), full(ba),
            full(wb), full(bb),
            full(wc), full(bc),
        ],
        out_specs=pl.BlockSpec((None, ctot, HW), lambda b: (b, 0, 0)),
    )

    out = pl.pallas_call(
        _make_dense_layer_kernel(H, W, g2),
        out_shape=jax.ShapeDtypeStruct((N, ctot, HW), x_nchw.dtype),
        grid_spec=grid_spec,
        compiler_params=pltpu.CompilerParams(
            dimension_semantics=("parallel",),
            vmem_limit_bytes=32 * 1024 * 1024),
    )(x, masks, wa, ba, wb, bb, wc, bc)

    return out.reshape(N, ctot, H, W)                   # already NCHW


# --------------------------- Parameter creation ----------------------------- #

def init_dense_layer_params(key, in_planes, growth_rate, bottleneck_width):
    inter = bottleneck_width * growth_rate // 2
    g2 = growth_rate // 2

    def conv_w(k, ksize, cin, cout):
        return 0.1 * jax.random.normal(k, (ksize * ksize, cin, cout), jnp.float32)

    def bn(k, c):
        k1, k2, k3, k4 = jax.random.split(k, 4)
        gamma = 1.0 + 0.1 * jax.random.normal(k1, (c,), jnp.float32)
        beta = 0.1 * jax.random.normal(k2, (c,), jnp.float32)
        mean = 0.1 * jax.random.normal(k3, (c,), jnp.float32)
        var = 1.0 + jnp.abs(jax.random.normal(k4, (c,), jnp.float32))
        return (gamma, beta, mean, var)

    ks = jax.random.split(key, 10)
    return {
        "cb1_a": (conv_w(ks[0], 1, in_planes, inter), bn(ks[1], inter)),
        "cb1_b": (conv_w(ks[2], 3, inter, g2), bn(ks[3], g2)),
        "cb2_a": (conv_w(ks[4], 1, in_planes, inter), bn(ks[5], inter)),
        "cb2_b": (conv_w(ks[6], 3, inter, g2), bn(ks[7], g2)),
        "cb2_c": (conv_w(ks[8], 3, g2, g2), bn(ks[9], g2)),
    }


# ----------------------- Pure-JAX reference (for check) --------------------- #

def _ref_conv_block(x_nchw, w, bn, ksize):
    kh = kw = ksize
    cin, cout = w.shape[1], w.shape[2]
    w_hwio = w.reshape(kh, kw, cin, cout)
    pad = (ksize - 1) // 2
    y = lax.conv_general_dilated(
        x_nchw, w_hwio, (1, 1), ((pad, pad), (pad, pad)),
        dimension_numbers=("NCHW", "HWIO", "NCHW"))
    gamma, beta, mean, var = bn
    y = ((y - mean[None, :, None, None])
         / jnp.sqrt(var + EPS)[None, :, None, None]
         * gamma[None, :, None, None] + beta[None, :, None, None])
    return jnp.maximum(y, 0.0)


def dense_layer_reference(x_nchw, params):
    w, b = params["cb1_a"]; cb1_a = _ref_conv_block(x_nchw, w, b, 1)
    w, b = params["cb1_b"]; cb1_b = _ref_conv_block(cb1_a, w, b, 3)
    w, b = params["cb2_a"]; cb2_a = _ref_conv_block(x_nchw, w, b, 1)
    w, b = params["cb2_b"]; cb2_b = _ref_conv_block(cb2_a, w, b, 3)
    w, b = params["cb2_c"]; cb2_c = _ref_conv_block(cb2_b, w, b, 3)
    return jnp.concatenate([x_nchw, cb1_b, cb2_c], axis=1)


# --------------------------------- Main ------------------------------------- #

if __name__ == "__main__":
    key = jax.random.PRNGKey(0)
    k_x, k_p = jax.random.split(key)

    N, C, H, W = 2, 8, 16, 16        # PyTorch-style NCHW input
    growth_rate, bottleneck_width = 8, 2

    x = jax.random.normal(k_x, (N, C, H, W), jnp.float32)
    params = init_dense_layer_params(k_p, C, growth_rate, bottleneck_width)

    out = jax.block_until_ready(dense_layer_forward(x, params))
    assert out.shape == (N, C + growth_rate, H, W), out.shape

    ref = jax.block_until_ready(dense_layer_reference(x, params))
    assert jnp.allclose(out, ref, atol=1e-4, rtol=1e-4), "mismatch vs reference"

    print("KERNEL_OK")
</pallas_src>

<mosaic_0001>
module attributes {stable_mosaic.version = 11 : i64} {
  func.func @kernel(%arg0: i32, %arg1: memref<1x8x256xf32, #tpu.memory_space<vmem>>, %arg2: memref<9x256xf32, #tpu.memory_space<vmem>>, %arg3: memref<16x8xf32, #tpu.memory_space<vmem>>, %arg4: memref<16x1xf32, #tpu.memory_space<vmem>>, %arg5: memref<8x144xf32, #tpu.memory_space<vmem>>, %arg6: memref<8x1xf32, #tpu.memory_space<vmem>>, %arg7: memref<4x36xf32, #tpu.memory_space<vmem>>, %arg8: memref<4x1xf32, #tpu.memory_space<vmem>>, %arg9: memref<1x16x256xf32, #tpu.memory_space<vmem>>) attributes {dimension_semantics = [#tpu.dimension_semantics<parallel>], iteration_bounds = array<i64: 2>, scalar_prefetch = 0 : i64, scratch_operands = 0 : i64, tpu.core_type = #tpu.core_type<tc>, window_params = [{transform_indices = @transform_0, window_bounds = array<i64: 1, 8, 256>}, {pipeline_mode = #tpu.pipeline_mode<synchronous>, transform_indices = @transform_1, window_bounds = array<i64: 9, 256>}, {pipeline_mode = #tpu.pipeline_mode<synchronous>, transform_indices = @transform_2, window_bounds = array<i64: 16, 8>}, {pipeline_mode = #tpu.pipeline_mode<synchronous>, transform_indices = @transform_3, window_bounds = array<i64: 16, 1>}, {pipeline_mode = #tpu.pipeline_mode<synchronous>, transform_indices = @transform_4, window_bounds = array<i64: 8, 144>}, {pipeline_mode = #tpu.pipeline_mode<synchronous>, transform_indices = @transform_5, window_bounds = array<i64: 8, 1>}, {pipeline_mode = #tpu.pipeline_mode<synchronous>, transform_indices = @transform_6, window_bounds = array<i64: 4, 36>}, {pipeline_mode = #tpu.pipeline_mode<synchronous>, transform_indices = @transform_7, window_bounds = array<i64: 4, 1>}, {transform_indices = @transform_8, window_bounds = array<i64: 1, 16, 256>}]} {
    %c0 = arith.constant 0 : index
    %c0_0 = arith.constant 0 : index
    %c0_1 = arith.constant 0 : index
    %0 = vector.load %arg1[%c0, %c0_0, %c0_1] : memref<1x8x256xf32, #tpu.memory_space<vmem>>, vector<1x8x256xf32>
    %1 = vector.shape_cast %0 : vector<1x8x256xf32> to vector<8x256xf32>
    %c0_2 = arith.constant 0 : index
    %c0_3 = arith.constant 0 : index
    %2 = vector.load %arg2[%c0_2, %c0_3] : memref<9x256xf32, #tpu.memory_space<vmem>>, vector<9x256xf32>
    %c0_4 = arith.constant 0 : index
    %c0_5 = arith.constant 0 : index
    %3 = vector.load %arg3[%c0_4, %c0_5] : memref<16x8xf32, #tpu.memory_space<vmem>>, vector<16x8xf32>
    %cst = arith.constant dense<0.000000e+00> : vector<16x256xf32>
    %4 = tpu.matmul %3, %1, %cst {dimension_numbers = #tpu.dot_dimension_numbers<[1], [0], [0], [1], [0, 0, 1, 1], [], []>} : vector<16x8xf32>, vector<8x256xf32>, vector<16x256xf32> -> vector<16x256xf32>
    %c0_6 = arith.constant 0 : index
    %c0_7 = arith.constant 0 : index
    %5 = vector.load %arg4[%c0_6, %c0_7] : memref<16x1xf32, #tpu.memory_space<vmem>>, vector<16x1xf32>
    %6 = vector.broadcast %5 : vector<16x1xf32> to vector<16x256xf32>
    %7 = arith.addf %4, %6 : vector<16x256xf32>
    %cst_8 = arith.constant 0.000000e+00 : f32
    %8 = vector.broadcast %cst_8 : f32 to vector<16x256xf32>
    %9 = arith.maximumf %7, %8 : vector<16x256xf32>
    %c0_9 = arith.constant 0 : index
    %c0_10 = arith.constant 0 : index
    %10 = vector.load %arg5[%c0_9, %c0_10] : memref<8x144xf32, #tpu.memory_space<vmem>>, vector<8x144xf32>
    %c17_i32 = arith.constant 17 : i32
    %11 = tpu.dynamic_rotate %9 by %c17_i32 dim 1 : vector<16x256xf32>, i32 -> vector<16x256xf32>
    %12 = vector.extract_strided_slice %2 {offsets = [0, 0], sizes = [1, 256], strides = [1, 1]} : vector<9x256xf32> to vector<1x256xf32>
    %13 = vector.broadcast %12 : vector<1x256xf32> to vector<16x256xf32>
    %14 = arith.mulf %11, %13 : vector<16x256xf32>
    %c16_i32 = arith.constant 16 : i32
    %15 = tpu.dynamic_rotate %9 by %c16_i32 dim 1 : vector<16x256xf32>, i32 -> vector<16x256xf32>
    %16 = vector.extract_strided_slice %2 {offsets = [1, 0], sizes = [1, 256], strides = [1, 1]} : vector<9x256xf32> to vector<1x256xf32>
    %17 = vector.broadcast %16 : vector<1x256xf32> to vector<16x256xf32>
    %18 = arith.mulf %15, %17 : vector<16x256xf32>
    %c15_i32 = arith.constant 15 : i32
    %19 = tpu.dynamic_rotate %9 by %c15_i32 dim 1 : vector<16x256xf32>, i32 -> vector<16x256xf32>
    %20 = vector.extract_strided_slice %2 {offsets = [2, 0], sizes = [1, 256], strides = [1, 1]} : vector<9x256xf32> to vector<1x256xf32>
    %21 = vector.broadcast %20 : vector<1x256xf32> to vector<16x256xf32>
    %22 = arith.mulf %19, %21 : vector<16x256xf32>
    %c1_i32 = arith.constant 1 : i32
    %23 = tpu.dynamic_rotate %9 by %c1_i32 dim 1 : vector<16x256xf32>, i32 -> vector<16x256xf32>
    %24 = vector.extract_strided_slice %2 {offsets = [3, 0], sizes = [1, 256], strides = [1, 1]} : vector<9x256xf32> to vector<1x256xf32>
    %25 = vector.broadcast %24 : vector<1x256xf32> to vector<16x256xf32>
    %26 = arith.mulf %23, %25 : vector<16x256xf32>
    %27 = vector.extract_strided_slice %2 {offsets = [4, 0], sizes = [1, 256], strides = [1, 1]} : vector<9x256xf32> to vector<1x256xf32>
    %28 = vector.broadcast %27 : vector<1x256xf32> to vector<16x256xf32>
    %29 = arith.mulf %9, %28 : vector<16x256xf32>
    %c255_i32 = arith.constant 255 : i32
    %30 = tpu.dynamic_rotate %9 by %c255_i32 dim 1 : vector<16x256xf32>, i32 -> vector<16x256xf32>
    %31 = vector.extract_strided_slice %2 {offsets = [5, 0], sizes = [1, 256], strides = [1, 1]} : vector<9x256xf32> to vector<1x256xf32>
    %32 = vector.broadcast %31 : vector<1x256xf32> to vector<16x256xf32>
    %33 = arith.mulf %30, %32 : vector<16x256xf32>
    %c241_i32 = arith.constant 241 : i32
    %34 = tpu.dynamic_rotate %9 by %c241_i32 dim 1 : vector<16x256xf32>, i32 -> vector<16x256xf32>
    %35 = vector.extract_strided_slice %2 {offsets = [6, 0], sizes = [1, 256], strides = [1, 1]} : vector<9x256xf32> to vector<1x256xf32>
    %36 = vector.broadcast %35 : vector<1x256xf32> to vector<16x256xf32>
    %37 = arith.mulf %34, %36 : vector<16x256xf32>
    %c240_i32 = arith.constant 240 : i32
    %38 = tpu.dynamic_rotate %9 by %c240_i32 dim 1 : vector<16x256xf32>, i32 -> vector<16x256xf32>
    %39 = vector.extract_strided_slice %2 {offsets = [7, 0], sizes = [1, 256], strides = [1, 1]} : vector<9x256xf32> to vector<1x256xf32>
    %40 = vector.broadcast %39 : vector<1x256xf32> to vector<16x256xf32>
    %41 = arith.mulf %38, %40 : vector<16x256xf32>
    %c239_i32 = arith.constant 239 : i32
    %42 = tpu.dynamic_rotate %9 by %c239_i32 dim 1 : vector<16x256xf32>, i32 -> vector<16x256xf32>
    %43 = vector.extract_strided_slice %2 {offsets = [8, 0], sizes = [1, 256], strides = [1, 1]} : vector<9x256xf32> to vector<1x256xf32>
    %44 = vector.broadcast %43 : vector<1x256xf32> to vector<16x256xf32>
    %45 = arith.mulf %42, %44 : vector<16x256xf32>
    %46 = tpu.concatenate %14, %18, %22, %26, %29, %33, %37, %41, %45 in 0 : vector<16x256xf32>, vector<16x256xf32>, vector<16x256xf32>, vector<16x256xf32>, vector<16x256xf32>, vector<16x256xf32>, vector<16x256xf32>, vector<16x256xf32>, vector<16x256xf32> -> vector<144x256xf32>
    %cst_11 = arith.constant dense<0.000000e+00> : vector<8x256xf32>
    %47 = tpu.matmul %10, %46, %cst_11 {dimension_numbers = #tpu.dot_dimension_numbers<[1], [0], [0], [1], [0, 0, 1, 1], [], []>} : vector<8x144xf32>, vector<144x256xf32>, vector<8x256xf32> -> vector<8x256xf32>
    %c0_12 = arith.constant 0 : index
    %c0_13 = arith.constant 0 : index
    %48 = vector.load %arg6[%c0_12, %c0_13] : memref<8x1xf32, #tpu.memory_space<vmem>>, vector<8x1xf32>
    %49 = vector.broadcast %48 : vector<8x1xf32> to vector<8x256xf32>
    %50 = arith.addf %47, %49 : vector<8x256xf32>
    %cst_14 = arith.constant 0.000000e+00 : f32
    %51 = vector.broadcast %cst_14 : f32 to vector<8x256xf32>
    %52 = arith.maximumf %50, %51 : vector<8x256xf32>
    %c0_15 = arith.constant 0 : index
    %c0_16 = arith.constant 0 : index
    %53 = vector.load %arg7[%c0_15, %c0_16] : memref<4x36xf32, #tpu.memory_space<vmem>>, vector<4x36xf32>
    %54 = vector.extract_strided_slice %52 {offsets = [4, 0], sizes = [4, 256], strides = [1, 1]} : vector<8x256xf32> to vector<4x256xf32>
    %c17_i32_17 = arith.constant 17 : i32
    %55 = tpu.dynamic_rotate %54 by %c17_i32_17 dim 1 : vector<4x256xf32>, i32 -> vector<4x256xf32>
    %56 = vector.extract_strided_slice %2 {offsets = [0, 0], sizes = [1, 256], strides = [1, 1]} : vector<9x256xf32> to vector<1x256xf32>
    %57 = vector.broadcast %56 : vector<1x256xf32> to vector<4x256xf32>
    %58 = arith.mulf %55, %57 : vector<4x256xf32>
    %c16_i32_18 = arith.constant 16 : i32
    %59 = tpu.dynamic_rotate %54 by %c16_i32_18 dim 1 : vector<4x256xf32>, i32 -> vector<4x256xf32>
    %60 = vector.extract_strided_slice %2 {offsets = [1, 0], sizes = [1, 256], strides = [1, 1]} : vector<9x256xf32> to vector<1x256xf32>
    %61 = vector.broadcast %60 : vector<1x256xf32> to vector<4x256xf32>
    %62 = arith.mulf %59, %61 : vector<4x256xf32>
    %c15_i32_19 = arith.constant 15 : i32
    %63 = tpu.dynamic_rotate %54 by %c15_i32_19 dim 1 : vector<4x256xf32>, i32 -> vector<4x256xf32>
    %64 = vector.extract_strided_slice %2 {offsets = [2, 0], sizes = [1, 256], strides = [1, 1]} : vector<9x256xf32> to vector<1x256xf32>
    %65 = vector.broadcast %64 : vector<1x256xf32> to vector<4x256xf32>
    %66 = arith.mulf %63, %65 : vector<4x256xf32>
    %c1_i32_20 = arith.constant 1 : i32
    %67 = tpu.dynamic_rotate %54 by %c1_i32_20 dim 1 : vector<4x256xf32>, i32 -> vector<4x256xf32>
    %68 = vector.extract_strided_slice %2 {offsets = [3, 0], sizes = [1, 256], strides = [1, 1]} : vector<9x256xf32> to vector<1x256xf32>
    %69 = vector.broadcast %68 : vector<1x256xf32> to vector<4x256xf32>
    %70 = arith.mulf %67, %69 : vector<4x256xf32>
    %71 = vector.extract_strided_slice %2 {offsets = [4, 0], sizes = [1, 256], strides = [1, 1]} : vector<9x256xf32> to vector<1x256xf32>
    %72 = vector.broadcast %71 : vector<1x256xf32> to vector<4x256xf32>
    %73 = arith.mulf %54, %72 : vector<4x256xf32>
    %c255_i32_21 = arith.constant 255 : i32
    %74 = tpu.dynamic_rotate %54 by %c255_i32_21 dim 1 : vector<4x256xf32>, i32 -> vector<4x256xf32>
    %75 = vector.extract_strided_slice %2 {offsets = [5, 0], sizes = [1, 256], strides = [1, 1]} : vector<9x256xf32> to vector<1x256xf32>
    %76 = vector.broadcast %75 : vector<1x256xf32> to vector<4x256xf32>
    %77 = arith.mulf %74, %76 : vector<4x256xf32>
    %c241_i32_22 = arith.constant 241 : i32
    %78 = tpu.dynamic_rotate %54 by %c241_i32_22 dim 1 : vector<4x256xf32>, i32 -> vector<4x256xf32>
    %79 = vector.extract_strided_slice %2 {offsets = [6, 0], sizes = [1, 256], strides = [1, 1]} : vector<9x256xf32> to vector<1x256xf32>
    %80 = vector.broadcast %79 : vector<1x256xf32> to vector<4x256xf32>
    %81 = arith.mulf %78, %80 : vector<4x256xf32>
    %c240_i32_23 = arith.constant 240 : i32
    %82 = tpu.dynamic_rotate %54 by %c240_i32_23 dim 1 : vector<4x256xf32>, i32 -> vector<4x256xf32>
    %83 = vector.extract_strided_slice %2 {offsets = [7, 0], sizes = [1, 256], strides = [1, 1]} : vector<9x256xf32> to vector<1x256xf32>
    %84 = vector.broadcast %83 : vector<1x256xf32> to vector<4x256xf32>
    %85 = arith.mulf %82, %84 : vector<4x256xf32>
    %c239_i32_24 = arith.constant 239 : i32
    %86 = tpu.dynamic_rotate %54 by %c239_i32_24 dim 1 : vector<4x256xf32>, i32 -> vector<4x256xf32>
    %87 = vector.extract_strided_slice %2 {offsets = [8, 0], sizes = [1, 256], strides = [1, 1]} : vector<9x256xf32> to vector<1x256xf32>
    %88 = vector.broadcast %87 : vector<1x256xf32> to vector<4x256xf32>
    %89 = arith.mulf %86, %88 : vector<4x256xf32>
    %90 = tpu.concatenate %58, %62, %66, %70, %73, %77, %81, %85, %89 in 0 : vector<4x256xf32>, vector<4x256xf32>, vector<4x256xf32>, vector<4x256xf32>, vector<4x256xf32>, vector<4x256xf32>, vector<4x256xf32>, vector<4x256xf32>, vector<4x256xf32> -> vector<36x256xf32>
    %cst_25 = arith.constant dense<0.000000e+00> : vector<4x256xf32>
    %91 = tpu.matmul %53, %90, %cst_25 {dimension_numbers = #tpu.dot_dimension_numbers<[1], [0], [0], [1], [0, 0, 1, 1], [], []>} : vector<4x36xf32>, vector<36x256xf32>, vector<4x256xf32> -> vector<4x256xf32>
    %c0_26 = arith.constant 0 : index
    %c0_27 = arith.constant 0 : index
    %92 = vector.load %arg8[%c0_26, %c0_27] : memref<4x1xf32, #tpu.memory_space<vmem>>, vector<4x1xf32>
    %93 = vector.broadcast %92 : vector<4x1xf32> to vector<4x256xf32>
    %94 = arith.addf %91, %93 : vector<4x256xf32>
    %cst_28 = arith.constant 0.000000e+00 : f32
    %95 = vector.broadcast %cst_28 : f32 to vector<4x256xf32>
    %96 = arith.maximumf %94, %95 : vector<4x256xf32>
    %97 = vector.extract_strided_slice %52 {offsets = [0, 0], sizes = [4, 256], strides = [1, 1]} : vector<8x256xf32> to vector<4x256xf32>
    %98 = tpu.concatenate %1, %97, %96 in 0 : vector<8x256xf32>, vector<4x256xf32>, vector<4x256xf32> -> vector<16x256xf32>
    %c0_29 = arith.constant 0 : index
    %c0_30 = arith.constant 0 : index
    %c0_31 = arith.constant 0 : index
    %99 = vector.load %arg9[%c0_29, %c0_30, %c0_31] : memref<1x16x256xf32, #tpu.memory_space<vmem>>, vector<1x16x256xf32>
    %100 = vector.shape_cast %99 : vector<1x16x256xf32> to vector<16x256xf32>
    %101 = vector.shape_cast %98 : vector<16x256xf32> to vector<1x16x256xf32>
    tpu.vector_store %arg9[%c0_29, %c0_30, %c0_31], %101 {strides = array<i32>} : memref<1x16x256xf32, #tpu.memory_space<vmem>>, vector<1x16x256xf32>,
    return
  }
  func.func @transform_0(%arg0: i32) -> (i32, i32, i32) {
    %c0_i32 = arith.constant 0 : i32
    %c0_i32_0 = arith.constant 0 : i32
    %c0_i32_1 = arith.constant 0 : i32
    return %arg0, %c0_i32, %c0_i32_0 : i32, i32, i32
  }
  func.func @transform_1(%arg0: i32) -> (i32, i32) {
    %c0_i32 = arith.constant 0 : i32
    %c0_i32_0 = arith.constant 0 : i32
    %c0_i32_1 = arith.constant 0 : i32
    return %c0_i32, %c0_i32_0 : i32, i32
  }
  func.func @transform_2(%arg0: i32) -> (i32, i32) {
    %c0_i32 = arith.constant 0 : i32
    %c0_i32_0 = arith.constant 0 : i32
    %c0_i32_1 = arith.constant 0 : i32
    return %c0_i32, %c0_i32_0 : i32, i32
  }
  func.func @transform_3(%arg0: i32) -> (i32, i32) {
    %c0_i32 = arith.constant 0 : i32
    %c0_i32_0 = arith.constant 0 : i32
    %c0_i32_1 = arith.constant 0 : i32
    return %c0_i32, %c0_i32_0 : i32, i32
  }
  func.func @transform_4(%arg0: i32) -> (i32, i32) {
    %c0_i32 = arith.constant 0 : i32
    %c0_i32_0 = arith.constant 0 : i32
    %c0_i32_1 = arith.constant 0 : i32
    return %c0_i32, %c0_i32_0 : i32, i32
  }
  func.func @transform_5(%arg0: i32) -> (i32, i32) {
    %c0_i32 = arith.constant 0 : i32
    %c0_i32_0 = arith.constant 0 : i32
    %c0_i32_1 = arith.constant 0 : i32
    return %c0_i32, %c0_i32_0 : i32, i32
  }
  func.func @transform_6(%arg0: i32) -> (i32, i32) {
    %c0_i32 = arith.constant 0 : i32
    %c0_i32_0 = arith.constant 0 : i32
    %c0_i32_1 = arith.constant 0 : i32
    return %c0_i32, %c0_i32_0 : i32, i32
  }
  func.func @transform_7(%arg0: i32) -> (i32, i32) {
    %c0_i32 = arith.constant 0 : i32
    %c0_i32_0 = arith.constant 0 : i32
    %c0_i32_1 = arith.constant 0 : i32
    return %c0_i32, %c0_i32_0 : i32, i32
  }
  func.func @transform_8(%arg0: i32) -> (i32, i32, i32) {
    %c0_i32 = arith.constant 0 : i32
    %c0_i32_0 = arith.constant 0 : i32
    %c0_i32_1 = arith.constant 0 : i32
    return %arg0, %c0_i32, %c0_i32_0 : i32, i32, i32
  }
}

</mosaic_0001>

<bundles_post_ra>
// kernel: tpu_custom_call.1
= control target key start
LH: loop header
LB: loop body
LE: loop exit
PB: predicated region body
PF: predicated region fallthrough
CT: control target
= control target key end

     0   :  { %13 = vsyncpa [#allocation3], 0  ;;  %s1755_s0 = inlined_call_operand.vmem [shape: f32[2,8,256], index: 0, kind: input, shape index: {}]   ;;  %s1756_s1 = inlined_call_operand.hbm [shape: f32[9,256], index: 1, kind: input, shape index: {}]   ;;  %s1757_s2 = inlined_call_operand.vmem [shape: f32[16,8], index: 2, kind: input, shape index: {}]   ;;  %s1758_s3 = inlined_call_operand.vmem [shape: f32[16,1], index: 3, kind: input, shape index: {}]   ;;  %s1759_s4 = inlined_call_operand.hbm [shape: f32[8,144], index: 4, kind: input, shape index: {}]   ;;  %s1760_s5 = inlined_call_operand.vmem [shape: f32[8,1], index: 5, kind: input, shape index: {}]   ;;  %s1761_s6 = inlined_call_operand.vmem [shape: f32[4,36], index: 6, kind: input, shape index: {}]   ;;  %s1762_s7 = inlined_call_operand.vmem [shape: f32[4,1], index: 7, kind: input, shape index: {}]   ;;  %s1763_s8 = inlined_call_operand.hbm [shape: f32[2,16,256], index: 8, kind: output, shape index: {}]  }
   0x1   :  { %14 = vsyncpa [#allocation6], 0 }
   0x2   :  { %15 = vsyncpa [#allocation4], 0 }
   0x3   :  { %17 = vsyncpa [#allocation4 + $0x1], 0  ;;  %s1244_s27 = smov 0   ;;  %s1246_s28 = smov 0  }
   0x4   :  { %s1248_s29 = smov 0   ;;  %s1250_s30 = smov 0  }
   0x5 LB: > { %s1265_s9 = sadd.s32 4294967295, %s1183_s30   ;;  %s949_s10 = sadd.s32 4294967294, %s1183_s30   ;;  %s1183_s30 = sphi %s1250_s30, %s1770_s30   ;;  %s1179_s29 = sphi %s1248_s29, %s1769_s29   ;;  %s1175_s28 = sphi %s1246_s28, %s1768_s28   ;;  %s1171_s27 = sphi %s1244_s27, %s1767_s27  }
   0x6   : > { %s1269_s11 = sadd.s32 1, %s1183_s30   ;;  %s203_s12 = sadd.s32 1, %s1179_s29 }
   0x7   : > { %s200_s13 = ssub.s32 %s1183_s30, %s1269_s11  ;;  %p213_p0 = scmp.ne.s32.totalorder %s1179_s29, %s1175_s28 }
   0x8   : > { %p201_p1 = scmp.eq.s32.totalorder %s200_s13, 0  ;;  %p214_p2 = scmp.eq.s32.totalorder %s1265_s9, 1 }
   0x9   : > { %p219_p3 = scmp.ne.s32.totalorder %s1175_s28, %s1171_s27  ;;  %p220_p4 = scmp.eq.s32.totalorder %s949_s10, 1 }
   0xa   : > { %s1280_s14 = scalar_select %p201_p1, %s1179_s29, %s203_s12  }
   0xb   : > { %p1282_p5 = por %p214_p2, %p213_p0  ;;  %p1286_p6 = por %p220_p4, %p219_p3 }
   0xc   : > { %p950_p7 = scmp.ge.s32.totalorder %s1183_s30, 1  ;;  %p227_p8 = scmp.lt.s32.totalorder %s1183_s30, 3 }
   0xd   : > { %p998_p9 = scmp.eq.s32.totalorder %s1265_s9, 0  ;;  %s238_s20 = sshll.u32 %s1756_s1, 4  ;;  %s239_s20 = int_to_ptr.hbm [resolvable:$true] %s238_s20 }
   0xe   : > { %p1293_p10 = pnand %p950_p7, %p227_p8  ;;  %s1185_s21 = smov [#allocation2]  }
   0xf   : > { %s240_s22 = sshll.u32 %s1185_s21, 4  ;;  %s259_s25 = sshll.u32 %s1759_s4, 4  ;;  %s241_s22 = int_to_ptr.vmem [resolvable:$true] %s240_s22  ;;  %s260_s25 = int_to_ptr.hbm [resolvable:$true] %s259_s25 }
  0x10   : > { %p987_p11 = pneg %p1293_p10  ;;  %s1186_s26 = smov 256  }
  0x11   : > { %s1187_s10 = smov 16   ;;  %s1188_s12 = smov [#allocation5]  }
  0x12   : > { %p988_p12 = pnand %p998_p9, %p987_p11  ;;  %s261_s13 = sshll.u32 %s1188_s12, 4  ;;  %s262_s13 = int_to_ptr.vmem [resolvable:$true] %s261_s13 }
  0x13   : > { %291 = sbr.rel (%p1293_p10) target bundleno = 798 (0x31e), region = 52 }
  0x14   : > { %990 = dma.hbm_to_vmem [thread:$0]  (!%p988_p12), %s239_s20, 512, %s241_s22, [#allocation3], %s1186_s26, %s1186_s26, %s1187_s10  }
  0x15   : > { %993 = dma.hbm_to_vmem [thread:$0]  (!%p988_p12), %s260_s25, 256, %s262_s13, [#allocation6]  }
  0x18   : > { %1158 = dma.done.wait (%p998_p9), [#allocation3], 512  }
  0x19   : > { %1160 = vsyncadd (%p998_p9), [#allocation3], 4294966784 }
  0x1a   : > { %1162 = dma.done.wait (%p998_p9), [#allocation6], 256  }
  0x1b   : > { %1164 = vsyncadd (%p998_p9), [#allocation6], 4294967040  ;;  %p331_p13 = scmp.lt.s32.totalorder %s1265_s9, 1  ;;  %v1189_v0 = vmov 0   ;;  %s328_s17 = sand.u32 1, %s1175_s28   ;;  %vm356_vm0 = vcmask 64512   ;;  %v423_v33 = vlaneseq }
  0x1c   : > { %1049 = vset.pattern.permute.xlu0 %v1189_v0  ;;  %1050 = vset.pattern.permute.xlu1 %v1189_v0  ;;  %s957_s19 = sshll.u32 %s328_s17, 5  ;;  %v345_v1 = vld [vmem:[%s1758_s3 + $0x8] sm:$0xff]  ;;  %v342_v4 = vld [vmem:[%s1757_s2] sm:$0xff]  ;;  %s1190_s21 = smov 112   ;;  %vm581_vm7 = vcmask 130048   ;;  %vm770_vm10 = vcmask 1043456  }
  0x1d   : > { %s332_s18 = scalar_select %p331_p13, %s1265_s9, 1  ;;  %353 = vperm.xlu0 %1049, %v345_v1   ;;  %v344_v5 = vld [vmem:[%s1758_s3] sm:$0xff]  ;;  %v343_v6 = vld [vmem:[%s1757_s2 + $0x8] sm:$0xff]  ;;  %v1431_v36 = vand.u32 127, %v423_v33  ;;  %vm785_vm11 = vcmask 293888  }
  0x1e   : > { %s1328_s26 = scalar_lea.vmem [#allocation7], %s957_s19  ;;  %s1191_s22 = smov 127   ;;  %v1436_v38 = vld [vmem:[#allocation2] sm:$0xff]  ;;  %v1438_v39 = vld [vmem:[#allocation2 + $0x8] sm:$0xff] }
  0x1f   : > { %s975_s20 = sshll.u32 %s332_s18, 4  ;;  %s1193_s24 = smov 1   ;;  %vm545_vm1 = vcmp.lt.s32.totalorder %v1431_v36, 112  ;;  %v1441_v42 = vperm.slane %v1436_v38, 7  ;;  %v1444_v43 = vperm.slane %v1438_v39, 7  ;;  %vm526_vm2 = vcmp.lt.s32.totalorder %v1431_v36, 113 }
  0x20   : > { %s335_s23 = scalar_lea.vmem %s1755_s0, %s975_s20  ;;  %s1194_s25 = smov 16   ;;  %v1460_v54 = vperm.slane %v1436_v38, 6  ;;  %v1463_v55 = vperm.slane %v1438_v39, 6  ;;  %vm507_vm3 = vcmp.lt.s32.totalorder %v1431_v36, 127  ;;  %vm482_vm4 = vcmp.lt.s32.totalorder %v1431_v36, 1 }
  0x21   : > { %v336_v2 = vld [vmem:[%s335_s23] sm:$0xff]  ;;  %v337_v3 = vld [vmem:[%s335_s23 + $0x8] sm:$0xff]  ;;  %s1192_s23 = smov 113   ;;  %s1195_s10 = smov 15   ;;  %v1522_v33 = vperm.slane %v1438_v39, 3  ;;  %vm463_vm5 = vcmp.lt.s32.totalorder %v1431_v36, 15 }
  0x22   : > { %378 = vmatpush.msra.mxu0 %v336_v2  ;;  %845 = vst [vmem:[%s1328_s26] sm:$0xff] %v336_v2  ;;  %401 = vmatpush.msra.mxu1 %v337_v3  ;;  %s1196_s12 = smov 111   ;;  %s1197_s13 = smov 17   ;;  %vm564_vm6 = vcmp.lt.s32.totalorder %v1431_v36, 111  ;;  %vm444_vm8 = vcmp.lt.s32.totalorder %v1431_v36, 16  ;;  %vm425_vm9 = vcmp.lt.s32.totalorder %v1431_v36, 17 }
  0x23   : > { %846 = vst [vmem:[%s1328_s26 + $0x8] sm:$0xff] %v337_v3  ;;  %960 = vmatmul.msk.f32.vlgmr.msra.gmra.mxu0 %vm356_vm0, %v342_v4  ;;  %962 = vmatmul.msk.f32.vlgmr.msra.gmra.mxu1 %vm356_vm0, %v342_v4  ;;  %v1479_v3 = vperm.slane %v1436_v38, 5  ;;  %v1482_v4 = vperm.slane %v1438_v39, 5  ;;  %v667_v36 = vld [vmem:[%s1761_s6] sm:$0xf] }
  0x25   : > { %348 = vperm.xlu0 %1049, %v344_v5  }
  0x2b   : > { %961 = vmatmul.msk.f32.gmra.mxu0 %vm356_vm0, %v343_v6  ;;  %963 = vmatmul.msk.f32.gmra.mxu1 %vm356_vm0, %v343_v6 }
  0x8f   : > { %v354_v7 = vpop.permute.xlu0 %353 }
  0x97   : > { %v349_v8 = vpop.permute.xlu0 %348 }
  0xa0   : > { %v380_v9 = vpop.f32.mrf.mxu0  ;;  %v403_v11 = vpop.f32.mrf.mxu1 }
  0xa1   : > { %v381_v10 = vadd.f32 %v380_v9, %v349_v8  ;;  %v404_v12 = vadd.f32 %v403_v11, %v349_v8 }
  0xa3   : > { %v1345_v13 = vmax.f32 %v381_v10, 0.0  ;;  %v1347_v14 = vmax.f32 %v404_v12, 0.0 }
  0xa5   : > { %537 = vrot.lane.b32.xlu2 %v1345_v13, %s1190_s21  ;;  %503 = vrot.lane.b32.xlu1 %v1347_v14, %s1191_s22 }
  0xa6   : > { %522 = vrot.lane.b32.xlu0 %v1347_v14, %s1192_s23 }
  0xa8   : > { %v383_v15 = vpop.f32.mrf.mxu0  ;;  %v406_v18 = vpop.f32.mrf.mxu1 }
  0xa9   : > { %v384_v16 = vadd.f32 %v383_v15, %v354_v7  ;;  %v407_v19 = vadd.f32 %v406_v18, %v354_v7  ;;  %v1500_v18 = vperm.slane %v1438_v39, 4 }
  0xab   : > { %v1367_v17 = vmax.f32 %v384_v16, 0.0  ;;  %v1375_v20 = vmax.f32 %v407_v19, 0.0  ;;  %v1497_v16 = vperm.slane %v1436_v38, 4 }
  0xad   : > { %541 = vrot.lane.b32.xlu2 %v1347_v14, %s1190_s21  ;;  %474 = vrot.lane.b32.xlu1 %v1345_v13, %s1193_s24  ;;  %v497_v19 = vmul.f32 %v1497_v16, %v1367_v17 }
  0xae   : > { %499 = vrot.lane.b32.xlu0 %v1345_v13, %s1191_s22 }
  0xb5   : > { %518 = vrot.lane.b32.xlu2 %v1345_v13, %s1192_s23  ;;  %436 = vrot.lane.b32.xlu1 %v1345_v13, %s1194_s25 }
  0xb6   : > { %459 = vrot.lane.b32.xlu0 %v1347_v14, %s1195_s10 }
  0xbd   : > { %478 = vrot.lane.b32.xlu2 %v1347_v14, %s1193_s24  ;;  %539 = vrot.lane.b32.xlu1 %v1367_v17, %s1190_s21 }
  0xbe   : > { %560 = vrot.lane.b32.xlu0 %v1347_v14, %s1196_s12 }
  0xc5   : > { %455 = vrot.lane.b32.xlu2 %v1345_v13, %s1195_s10  ;;  %543 = vrot.lane.b32.xlu1 %v1375_v20, %s1190_s21 }
  0xc6   : > { %520 = vrot.lane.b32.xlu0 %v1367_v17, %s1192_s23 }
  0xcd   : > { %556 = vrot.lane.b32.xlu2 %v1345_v13, %s1196_s12  ;;  %524 = vrot.lane.b32.xlu1 %v1375_v20, %s1192_s23 }
  0xce   : > { %480 = vrot.lane.b32.xlu0 %v1375_v20, %s1193_s24 }
  0xd5   : > { %440 = vrot.lane.b32.xlu2 %v1347_v14, %s1194_s25  ;;  %501 = vrot.lane.b32.xlu1 %v1367_v17, %s1191_s22 }
  0xd6   : > { %457 = vrot.lane.b32.xlu0 %v1367_v17, %s1195_s10 }
  0xdd   : > { %505 = vrot.lane.b32.xlu2 %v1375_v20, %s1191_s22  ;;  %461 = vrot.lane.b32.xlu1 %v1375_v20, %s1195_s10 }
  0xde   : > { %438 = vrot.lane.b32.xlu0 %v1367_v17, %s1194_s25 }
  0xe5   : > { %476 = vrot.lane.b32.xlu2 %v1367_v17, %s1193_s24  ;;  %558 = vrot.lane.b32.xlu1 %v1367_v17, %s1196_s12 }
  0xe6   : > { %417 = vrot.lane.b32.xlu0 %v1367_v17, %s1197_s13  ;;  %v496_v17 = vmul.f32 %v1500_v18, %v1347_v14 }
  0xed   : > { %562 = vrot.lane.b32.xlu2 %v1375_v20, %s1196_s12  ;;  %442 = vrot.lane.b32.xlu1 %v1375_v20, %s1194_s25 }
  0xee   : > { %419 = vrot.lane.b32.xlu0 %v1347_v14, %s1197_s13 }
  0xf5   : > { %415 = vrot.lane.b32.xlu2 %v1345_v13, %s1197_s13  ;;  %421 = vrot.lane.b32.xlu1 %v1375_v20, %s1197_s13 }
  0xff   : > { %v538_v21 = vpop.permute.xlu2 %537 }
 0x107   : > { %v542_v22 = vpop.permute.xlu2 %541 }
 0x108   : > { %v546_v44 = vsel %vm545_vm1, %v538_v21, %v542_v22  ;;  %v548_v45 = vsel %vm545_vm1, %v542_v22, %v538_v21  ;;  %v498_v21 = vmul.f32 %v1500_v18, %v1375_v20  ;;  %v1519_v20 = vperm.slane %v1436_v38, 3 }
 0x109   : > { %v552_v50 = vmul.f32 %v1441_v42, %v546_v44  ;;  %v553_v51 = vmul.f32 %v1444_v43, %v548_v45 }
 0x10f   : > { %v519_v23 = vpop.permute.xlu2 %518 }
 0x117   : > { %v504_v24 = vpop.permute.xlu1 %503  ;;  %v1417_v26 = vpop.permute.xlu2 %478 }
 0x118   : > { %v523_v25 = vpop.permute.xlu0 %522 }
 0x119   : > { %v527_v56 = vsel %vm526_vm2, %v519_v23, %v523_v25  ;;  %v529_v57 = vsel %vm526_vm2, %v523_v25, %v519_v23 }
 0x11a   : > { %v533_v63 = vmul.f32 %v1460_v54, %v527_v56  ;;  %v534_v0 = vmul.f32 %v1463_v55, %v529_v57 }
 0x11f   : > { %v1419_v27 = vpop.permute.xlu1 %474  ;;  %v1421_v29 = vpop.permute.xlu2 %455 }
 0x120   : > { %v500_v28 = vpop.permute.xlu0 %499 }
 0x121   : > { %v508_v5 = vsel %vm507_vm3, %v500_v28, %v504_v24  ;;  %v510_v6 = vsel %vm507_vm3, %v504_v24, %v500_v28  ;;  %v575_v24 = vld [vmem:[%s1760_s5] sm:$0xff]  ;;  %v495_v28 = vmul.f32 %v1497_v16, %v1345_v13 }
 0x122   : > { %v514_v12 = vmul.f32 %v1479_v3, %v508_v5  ;;  %v515_v15 = vmul.f32 %v1482_v4, %v510_v6  ;;  %578 = vperm.xlu1 %1050, %v575_v24  }
 0x127   : > { %v1423_v30 = vpop.permute.xlu1 %436  ;;  %v1427_v32 = vpop.permute.xlu2 %556 }
 0x128   : > { %v1425_v31 = vpop.permute.xlu0 %459 }
 0x12f   : > { %v540_v34 = vpop.permute.xlu1 %539  ;;  %v1434_v37 = vpop.permute.xlu2 %440 }
 0x130   : > { %v1429_v35 = vpop.permute.xlu0 %560 }
 0x137   : > { %v544_v40 = vpop.permute.xlu1 %543  ;;  %v506_v60 = vpop.permute.xlu2 %505 }
 0x138   : > { %v521_v41 = vpop.permute.xlu0 %520  ;;  %v549_v46 = vsel %vm545_vm1, %v544_v40, %v540_v34  ;;  %v547_v47 = vsel %vm545_vm1, %v540_v34, %v544_v40  ;;  %v483_v34 = vsel %vm482_vm4, %v1419_v27, %v1417_v26  ;;  %v485_v40 = vsel %vm482_vm4, %v1417_v26, %v1419_v27 }
 0x139   : > { %v554_v48 = vmul.f32 %v1441_v42, %v547_v47  ;;  %v555_v49 = vmul.f32 %v1444_v43, %v549_v46  ;;  %v489_v26 = vmul.f32 %v1519_v20, %v485_v40  ;;  %v490_v27 = vmul.f32 %v1522_v33, %v483_v34 }
 0x13a   : > { %v1542_v46 = vperm.slane %v1436_v38, 2  ;;  %v1545_v47 = vperm.slane %v1438_v39, 2 }
 0x13b   : > { %585 = vmatpush.msra.mxu2 %v554_v48  ;;  %625 = vmatpush.msrb.mxu0 %v555_v49  ;;  %v464_v48 = vsel %vm463_vm5, %v1421_v29, %v1425_v31  ;;  %v466_v49 = vsel %vm463_vm5, %v1425_v31, %v1421_v29  ;;  %v565_v29 = vsel %vm564_vm6, %v1427_v32, %v1429_v35 }
 0x13c   : > { %v470_v56 = vmul.f32 %v1542_v46, %v466_v49  ;;  %v471_v57 = vmul.f32 %v1545_v47, %v464_v48 }
 0x13d   : > { %586 = vmatpush.msra.mxu2 %v552_v50  ;;  %626 = vmatpush.msrb.mxu0 %v553_v51 }
 0x13f   : > { %v525_v52 = vpop.permute.xlu1 %524  ;;  %v477_v11 = vpop.permute.xlu2 %476 }
 0x140   : > { %v481_v53 = vpop.permute.xlu0 %480  ;;  %v528_v58 = vsel %vm526_vm2, %v521_v41, %v525_v52  ;;  %v530_v59 = vsel %vm526_vm2, %v525_v52, %v521_v41 }
 0x141   : > { %v535_v61 = vmul.f32 %v1460_v54, %v528_v58  ;;  %v536_v62 = vmul.f32 %v1463_v55, %v530_v59  ;;  %v484_v22 = vsel %vm482_vm4, %v477_v11, %v481_v53  ;;  %v486_v23 = vsel %vm482_vm4, %v481_v53, %v477_v11  ;;  %v1560_v58 = vld [vmem:[#allocation2 + $0x10] ss:$0 sm:$0xff] }
 0x142   : > { %v491_v14 = vmul.f32 %v1519_v20, %v486_v23  ;;  %v492_v41 = vmul.f32 %v1522_v33, %v484_v22  ;;  %v1607_v22 = vperm.slane %v1436_v38, 0  ;;  %v1610_v23 = vperm.slane %v1438_v39, 0 }
 0x143   : > { %587 = vmatpush.msra.mxu2 %v535_v61  ;;  %627 = vmatpush.msrb.mxu0 %v536_v62  ;;  %v1571_v61 = vld [vmem:[#allocation2 + $0x18] ss:$0 sm:$0xff]  ;;  %v567_v62 = vsel %vm564_vm6, %v1429_v35, %v1427_v32  ;;  %v1586_v32 = vperm.slane %v1438_v39, 1  ;;  %v445_v35 = vsel %vm444_vm8, %v1423_v30, %v1434_v37 }
 0x144   : > { %v572_v5 = vmul.f32 %v1571_v61, %v567_v62 }
 0x145   : > { %588 = vmatpush.msra.mxu2 %v533_v63  ;;  %628 = vmatpush.msrb.mxu0 %v534_v0  ;;  %v571_v0 = vmul.f32 %v1560_v58, %v565_v29 }
 0x147   : > { %v502_v1 = vpop.permute.xlu1 %501  ;;  %v563_v52 = vpop.permute.xlu2 %562 }
 0x148   : > { %v458_v2 = vpop.permute.xlu0 %457  ;;  %v509_v7 = vsel %vm507_vm3, %v502_v1, %v506_v60  ;;  %v511_v8 = vsel %vm507_vm3, %v506_v60, %v502_v1 }
 0x149   : > { %v516_v9 = vmul.f32 %v1479_v3, %v509_v7  ;;  %v517_v10 = vmul.f32 %v1482_v4, %v511_v8  ;;  %v1583_v7 = vperm.slane %v1436_v38, 1  ;;  %v447_v8 = vsel %vm444_vm8, %v1434_v37, %v1423_v30 }
 0x14b   : > { %589 = vmatpush.msra.mxu2 %v516_v9  ;;  %629 = vmatpush.msrb.mxu0 %v517_v10 }
 0x14d   : > { %590 = vmatpush.msra.mxu2 %v514_v12  ;;  %630 = vmatpush.msrb.mxu0 %v515_v15  ;;  %v451_v15 = vmul.f32 %v1583_v7, %v447_v8 }
 0x14f   : > { %v462_v25 = vpop.permute.xlu1 %461  ;;  %591 = vmatpush.msra.mxu2 %v497_v19  ;;  %631 = vmatpush.msrb.mxu0 %v498_v21  ;;  %v452_v19 = vmul.f32 %v1586_v32, %v445_v35  ;;  %v416_v37 = vpop.permute.xlu2 %415 }
 0x150   : > { %v439_v13 = vpop.permute.xlu0 %438  ;;  %v465_v44 = vsel %vm463_vm5, %v458_v2, %v462_v25  ;;  %v467_v45 = vsel %vm463_vm5, %v462_v25, %v458_v2  ;;  %v414_v2 = vld [vmem:[#allocation5 + $0x8] sm:$0xff] }
 0x151   : > { %592 = vmatpush.msra.mxu2 %v495_v28  ;;  %632 = vmatpush.msrb.mxu0 %v496_v17  ;;  %v472_v50 = vmul.f32 %v1542_v46, %v467_v45  ;;  %v473_v51 = vmul.f32 %v1545_v47, %v465_v44 }
 0x153   : > { %593 = vmatpush.msra.mxu2 %v491_v14  ;;  %633 = vmatpush.msrb.mxu0 %v492_v41 }
 0x155   : > { %594 = vmatpush.msra.mxu2 %v489_v26  ;;  %634 = vmatpush.msrb.mxu0 %v490_v27 }
 0x157   : > { %v559_v53 = vpop.permute.xlu1 %558  ;;  %595 = vmatpush.msra.mxu2 %v472_v50  ;;  %635 = vmatpush.msrb.mxu0 %v473_v51 }
 0x158   : > { %v566_v31 = vsel %vm564_vm6, %v559_v53, %v563_v52  ;;  %v568_v59 = vsel %vm564_vm6, %v563_v52, %v559_v53  ;;  %v418_v63 = vpop.permute.xlu0 %417 }
 0x159   : > { %596 = vmatpush.msra.mxu2 %v470_v56  ;;  %636 = vmatpush.msrb.mxu0 %v471_v57  ;;  %v573_v60 = vmul.f32 %v1560_v58, %v566_v31  ;;  %v574_v1 = vmul.f32 %v1571_v61, %v568_v59  ;;  %v779_v57 = vld [vmem:[%s1762_s7] sm:$0xf] }
 0x15b   : > { %619 = vmatpush.msra.mxu3 %v573_v60 }
 0x15d   : > { %620 = vmatpush.msra.mxu3 %v571_v0 }
 0x15e   : > { %964 = vmatmul.msk.f32.vlgmr.msra.gmra.mxu3 %vm581_vm7, %v414_v2 }
 0x15f   : > { %659 = vmatpush.msrb.mxu3 %v574_v1  ;;  %v443_v6 = vpop.permute.xlu1 %442 }
 0x160   : > { %v446_v9 = vsel %vm444_vm8, %v439_v13, %v443_v6  ;;  %v448_v10 = vsel %vm444_vm8, %v443_v6, %v439_v13  ;;  %v420_v30 = vpop.permute.xlu0 %419  ;;  %v413_v13 = vld [vmem:[#allocation5] sm:$0xff] }
 0x161   : > { %660 = vmatpush.msrb.mxu3 %v572_v5  ;;  %v453_v11 = vmul.f32 %v1583_v7, %v448_v10  ;;  %v454_v12 = vmul.f32 %v1586_v32, %v446_v9  ;;  %v426_v24 = vsel %vm425_vm9, %v416_v37, %v420_v30  ;;  %v428_v25 = vsel %vm425_vm9, %v420_v30, %v416_v37 }
 0x162   : > { %v432_v39 = vmul.f32 %v1607_v22, %v428_v25  ;;  %v433_v40 = vmul.f32 %v1610_v23, %v426_v24 }
 0x163   : > { %597 = vmatpush.msra.mxu2 %v453_v11  ;;  %637 = vmatpush.msrb.mxu0 %v454_v12 }
 0x165   : > { %598 = vmatpush.msra.mxu2 %v451_v15  ;;  %638 = vmatpush.msrb.mxu0 %v452_v19 }
 0x166   : > { %965 = vmatmul.msk.f32.vlgmr.msrb.gmra.mxu3 %vm581_vm7, %v414_v2 }
 0x167   : > { %v422_v21 = vpop.permute.xlu1 %421 }
 0x168   : > { %v427_v28 = vsel %vm425_vm9, %v418_v63, %v422_v21  ;;  %v429_v17 = vsel %vm425_vm9, %v422_v21, %v418_v63 }
 0x169   : > { %v434_v34 = vmul.f32 %v1607_v22, %v429_v17  ;;  %v435_v38 = vmul.f32 %v1610_v23, %v427_v28 }
 0x16b   : > { %599 = vmatpush.msra.mxu2 %v434_v34  ;;  %639 = vmatpush.msrb.mxu0 %v435_v38 }
 0x16d   : > { %600 = vmatpush.msra.mxu2 %v432_v39  ;;  %640 = vmatpush.msrb.mxu0 %v433_v40 }
 0x16e   : > { %601 = vmatmul.f32.vlgmr.msra.gmra.mxu2 %v413_v13  ;;  %641 = vmatmul.f32.vlgmr.msrb.gmra.mxu0 %v413_v13 }
 0x194   : > { %v579_v41 = vpop.permute.xlu1 %578 }
 0x1e1   : > { %v622_v14 = vpop.f32.mrf.mxu3 }
 0x1e9   : > { %v662_v45 = vpop.f32.mrf.mxu3 }
 0x1eb   : > { %v642_v44 = vpop.f32.mrf.mxu0 }
 0x1ec   : > { %v643_v26 = vadd.f32 %v642_v44, %v579_v41 }
 0x1ee   : > { %v663_v27 = vadd.f32 %v662_v45, %v643_v26 }
 0x1f0   : > { %v1624_v48 = vmax.f32 %v663_v27, 0.0 }
 0x1f1   : > { %v602_v50 = vpop.f32.mrf.mxu2 }
 0x1f2   : > { %v671_v49 = vrot.slane %v1624_v48, 4  ;;  %v603_v51 = vadd.f32 %v602_v50, %v579_v41  ;;  %v707_v10 = vmul.f32 %v1624_v48, %v1500_v18 }
 0x1f4   : > { %710 = vrot.lane.b32.xlu1 %v671_v49, %s1191_s22  ;;  %734 = vrot.lane.b32.xlu2 %v671_v49, %s1196_s12  ;;  %v623_v52 = vadd.f32 %v622_v14, %v603_v51  ;;  %v755_v28 = vrot.slane %v707_v10, 4 }
 0x1f5   : > { %726 = vrot.lane.b32.xlu0 %v671_v49, %s1190_s21 }
 0x1f6   : > { %v1633_v53 = vmax.f32 %v623_v52, 0.0 }
 0x1f8   : > { %v670_v56 = vrot.slane %v1633_v53, 4  ;;  %v706_v12 = vmul.f32 %v1633_v53, %v1497_v16 }
 0x1fa   : > { %v754_v17 = vrot.slane %v706_v12, 4 }
 0x1fc   : > { %684 = vrot.lane.b32.xlu1 %v671_v49, %s1194_s25  ;;  %700 = vrot.lane.b32.xlu2 %v671_v49, %s1193_s24 }
 0x1fd   : > { %718 = vrot.lane.b32.xlu0 %v671_v49, %s1192_s23 }
 0x204   : > { %732 = vrot.lane.b32.xlu1 %v670_v56, %s1196_s12  ;;  %724 = vrot.lane.b32.xlu2 %v670_v56, %s1190_s21 }
 0x205   : > { %708 = vrot.lane.b32.xlu0 %v670_v56, %s1191_s22 }
 0x20c   : > { %698 = vrot.lane.b32.xlu1 %v670_v56, %s1193_s24  ;;  %716 = vrot.lane.b32.xlu2 %v670_v56, %s1192_s23  ;;  %s976_s23 = sshll.u32 %s1265_s9, 5  ;;  %s850_s9 = scalar_lea.sflag [#allocation4], %s328_s17 }
 0x20d   : > { %682 = vrot.lane.b32.xlu0 %v670_v56, %s1194_s25  ;;  %s861_s12 = scalar_lea.hbm %s1763_s8, %s976_s23  ;;  %s1133_s23 = scalar_lea.hbm %s1763_s8, 64 }
 0x20e   : > { %s864_s20 = sshll.u32 %s861_s12, 4  ;;  %s865_s20 = int_to_ptr.hbm [resolvable:$true] %s864_s20 }
 0x20f   : > { %s1127_s19 = sshra.s32 %s865_s20, 4  ;;  %s1128_s19 = int_to_ptr.hbm [resolvable:$true] %s1127_s19 }
 0x210   : > { %s1129_s18 = scalar_lea.hbm %s1128_s19, 32  ;;  %p1134_p3 = scmp.lt.s32.totalorder %s1128_s19, %s1763_s8 }
 0x211   : > { %p1130_p0 = scmp.ne.s32.totalorder %s1128_s19, %s1129_s18  ;;  %p1135_p4 = scmp.lt.s32.totalorder %s1133_s23, %s1129_s18 }
 0x213   : > { %p1131_p1 = pnand %p1130_p0, %p1282_p5  ;;  %p1136_p7 = por %p1135_p4, %p1134_p3 }
 0x214   : > { %674 = vrot.lane.b32.xlu1 %v670_v56, %s1197_s13  ;;  %690 = vrot.lane.b32.xlu2 %v670_v56, %s1195_s10 }
 0x215   : > { %692 = vrot.lane.b32.xlu0 %v671_v49, %s1195_s10  ;;  %p1132_p2 = pneg %p1131_p1 }
 0x217   : > { %p1137_p8 = pnand %p1136_p7, %p1132_p2 }
 0x21c   : > { %676 = vrot.lane.b32.xlu2 %v671_v49, %s1197_s13  ;;  %s862_s13 = sshll.u32 %s1328_s26, 4  ;;  %s863_s13 = int_to_ptr.vmem [resolvable:$true] %s862_s13 }
 0x21d   : > { %782 = vperm.xlu0 %1049, %v779_v57  }
 0x24e   : > { %v735_v29 = vpop.permute.xlu2 %734 }
 0x256   : > { %v701_v31 = vpop.permute.xlu2 %700 }
 0x25e   : > { %v725_v62 = vpop.permute.xlu2 %724 }
 0x266   : > { %v711_v59 = vpop.permute.xlu1 %710  ;;  %v717_v5 = vpop.permute.xlu2 %716 }
 0x267   : > { %v727_v60 = vpop.permute.xlu0 %726 }
 0x268   : > { %v728_v1 = vsel %vm545_vm1, %v725_v62, %v727_v60  ;;  %v729_v2 = vsel %vm545_vm1, %v727_v60, %v725_v62 }
 0x269   : > { %v730_v8 = vmul.f32 %v728_v1, %v1441_v42  ;;  %v731_v9 = vmul.f32 %v729_v2, %v1444_v43 }
 0x26b   : > { %v767_v24 = vrot.slane %v731_v9, 4 }
 0x26e   : > { %v685_v63 = vpop.permute.xlu1 %684  ;;  %v691_v40 = vpop.permute.xlu2 %690 }
 0x26f   : > { %v719_v0 = vpop.permute.xlu0 %718 }
 0x270   : > { %v720_v6 = vsel %vm526_vm2, %v717_v5, %v719_v0  ;;  %v721_v35 = vsel %vm526_vm2, %v719_v0, %v717_v5 }
 0x271   : > { %v722_v15 = vmul.f32 %v720_v6, %v1460_v54  ;;  %v723_v19 = vmul.f32 %v721_v35, %v1463_v55  ;;  %v766_v54 = vrot.slane %v730_v8, 4 }
 0x273   : > { %v777_v39 = vsel %vm770_vm10, %v722_v15, %v766_v54 }
 0x276   : > { %v733_v11 = vpop.permute.xlu1 %732  ;;  %v677_v49 = vpop.permute.xlu2 %676 }
 0x277   : > { %v709_v30 = vpop.permute.xlu0 %708  ;;  %v736_v37 = vsel %vm564_vm6, %v733_v11, %v735_v29  ;;  %v737_v42 = vsel %vm564_vm6, %v735_v29, %v733_v11 }
 0x278   : > { %v712_v43 = vsel %vm507_vm3, %v709_v30, %v711_v59  ;;  %v713_v18 = vsel %vm507_vm3, %v711_v59, %v709_v30  ;;  %v738_v21 = vmul.f32 %v1560_v58, %v736_v37  ;;  %v739_v16 = vmul.f32 %v1571_v61, %v737_v42 }
 0x279   : > { %v714_v55 = vmul.f32 %v712_v43, %v1479_v3  ;;  %v715_v25 = vmul.f32 %v713_v18, %v1482_v4  ;;  %v778_v58 = vsel %vm770_vm10, %v723_v19, %v767_v24 }
 0x27a   : > { %966 = vmatpush.msk.msrb.mxu1 %vm770_vm10, %v738_v21  ;;  %968 = vmatpush.msk.msra.mxu3 %vm770_vm10, %v739_v16 }
 0x27b   : > { %v760_v34 = vrot.slane %v714_v55, 4  ;;  %v761_v38 = vrot.slane %v715_v25, 4 }
 0x27c   : > { %807 = vmatpush.msrb.mxu1 %v777_v39  ;;  %827 = vmatpush.msra.mxu3 %v778_v58 }
 0x27d   : > { %v775_v61 = vsel %vm770_vm10, %v754_v17, %v760_v34  ;;  %v776_v3 = vsel %vm770_vm10, %v755_v28, %v761_v38 }
 0x27e   : > { %v699_v4 = vpop.permute.xlu1 %698  ;;  %808 = vmatpush.msrb.mxu1 %v775_v61  ;;  %828 = vmatpush.msra.mxu3 %v776_v3 }
 0x27f   : > { %v683_v13 = vpop.permute.xlu0 %682  ;;  %v702_v14 = vsel %vm482_vm4, %v699_v4, %v701_v31  ;;  %v703_v41 = vsel %vm482_vm4, %v701_v31, %v699_v4 }
 0x280   : > { %v686_v44 = vsel %vm444_vm8, %v683_v13, %v685_v63  ;;  %v687_v45 = vsel %vm444_vm8, %v685_v63, %v683_v13  ;;  %v704_v26 = vmul.f32 %v703_v41, %v1519_v20  ;;  %v705_v27 = vmul.f32 %v702_v14, %v1522_v33 }
 0x281   : > { %v688_v51 = vmul.f32 %v687_v45, %v1583_v7  ;;  %v689_v52 = vmul.f32 %v686_v44, %v1586_v32 }
 0x282   : > { %v748_v31 = vrot.slane %v704_v26, 4  ;;  %v749_v59 = vrot.slane %v705_v27, 4 }
 0x283   : > { %v742_v63 = vrot.slane %v688_v51, 4  ;;  %v743_v0 = vrot.slane %v689_v52, 4 }
 0x286   : > { %v675_v50 = vpop.permute.xlu1 %674 }
 0x287   : > { %v693_v56 = vpop.permute.xlu0 %692  ;;  %v678_v57 = vsel %vm425_vm9, %v675_v50, %v677_v49  ;;  %v679_v29 = vsel %vm425_vm9, %v677_v49, %v675_v50 }
 0x288   : > { %v694_v20 = vsel %vm463_vm5, %v691_v40, %v693_v56  ;;  %v695_v33 = vsel %vm463_vm5, %v693_v56, %v691_v40  ;;  %v680_v32 = vmul.f32 %v679_v29, %v1607_v22  ;;  %v681_v62 = vmul.f32 %v678_v57, %v1610_v23 }
 0x289   : > { %v696_v60 = vmul.f32 %v695_v33, %v1542_v46  ;;  %v697_v7 = vmul.f32 %v694_v20, %v1545_v47 }
 0x28a   : > { %v771_v46 = vsel %vm770_vm10, %v680_v32, %v742_v63  ;;  %v772_v47 = vsel %vm770_vm10, %v681_v62, %v743_v0 }
 0x28b   : > { %v773_v1 = vsel %vm770_vm10, %v696_v60, %v748_v31  ;;  %v774_v2 = vsel %vm770_vm10, %v697_v7, %v749_v59 }
 0x28c   : > { %809 = vmatpush.msrb.mxu1 %v773_v1  ;;  %829 = vmatpush.msra.mxu3 %v774_v2 }
 0x28e   : > { %810 = vmatpush.msrb.mxu1 %v771_v46  ;;  %830 = vmatpush.msra.mxu3 %v772_v47 }
 0x28f   : > { %967 = vmatmul.msk.f32.vlgmr.msrb.gmra.mxu1 %vm785_vm11, %v667_v36  ;;  %969 = vmatmul.msk.f32.vlgmr.msra.gmra.mxu3 %vm785_vm11, %v667_v36  ;;  %v783_v22 = vpop.permute.xlu0 %782 }
 0x30c   : > { %v812_v23 = vpop.f32.mrf.mxu1 }
 0x30d   : > { %v813_v5 = vadd.f32 %v812_v23, %v783_v22 }
 0x30f   : > { %v835_v6 = vmax.f32 %v813_v5, 0.0 }
 0x311   : > { %v839_v35 = vrot.slane %v835_v6, 4 }
 0x312   : > { %v832_v8 = vpop.f32.mrf.mxu3 }
 0x313   : > { %v843_v9 = vsel %vm770_vm10, %v1633_v53, %v839_v35  ;;  %v833_v10 = vadd.f32 %v832_v8, %v783_v22 }
 0x314   : > { %847 = vst [vmem:[%s1328_s26 + $0x10] sm:$0xff] %v843_v9 }
 0x315   : > { %v836_v11 = vmax.f32 %v833_v10, 0.0 }
 0x317   : > { %v840_v12 = vrot.slane %v836_v11, 4 }
 0x319   : > { %v844_v15 = vsel %vm770_vm10, %v1624_v48, %v840_v12 }
 0x31a   : > { %848 = vst [vmem:[%s1328_s26 + $0x18] sm:$0xff] %v844_v15 }
 0x31b   : > { %1140 = shalt.err (!%p1137_p8)
}
 0x31c   : > { %s1198_s17 = smov 256  }
 0x31d   : > { %985 = dma.vmem_to_hbm [thread:$0]  (%p1282_p5), %s863_s13, 512, %s865_s20, %s850_s9, %s1198_s17, %s1198_s17, %s1194_s25  }
 0x31e PF: > { %p1002_p9 = scmp.ge.s32.totalorder %s1183_s30, 2  ;;  %s879_s26 = sand.u32 1, %s1171_s27  }
 0x31f   : > { %s880_s12 = scalar_lea.sflag [#allocation4], %s879_s26 }
 0x320   : > { %p995_p10 = pnand %p1002_p9, %p1286_p6 }
 0x322   : > { %p996_p11 = pneg %p995_p10 }
 0x324   : > { %1166 = dma.done.wait (%p996_p11), %s880_s12, 512  }
 0x325   : > { %1168 = vsyncadd (%p996_p11), %s880_s12, 4294966784  ;;  %p20_p12 = scmp.ge.s32.totalorder %s1269_s11, 4   ;;  %s1767_s27 = smov %s1175_s28 }
 0x326   : > { %s1768_s28 = smov %s1179_s29  ;;  %s1769_s29 = smov %s1280_s14 }
 0x327   : > { %s1770_s30 = smov %s1269_s11  ;;  %22 = sbr.rel (!%p20_p12) target bundleno = 5 (0x5), region = 96 }
 0x32c   :  { %886 = vsyncpa [#allocation3], 1 }
 0x32d   :  { %888 = vsyncpa [#allocation3 + $0x1], 1 }
 0x32e   :  { %889 = vsyncpa [#allocation6], 1 }
 0x32f   :  { %890 = vsyncpa [#allocation4], 1 }
 0x330   :  { %892 = vsyncpa [#allocation4 + $0x1], 1 }

</bundles_post_ra>
